<compile_context>
chip_gen: v7x
topology: tpu7x:2x2x1
jax: 0.10.0
libtpu: 0.0.40
codegen_flags: <defaults>
</compile_context>

<pallas_src>
import functools

import jax
import jax.numpy as jnp
from jax.experimental import pallas as pl
from jax.experimental.pallas import tpu as pltpu


# ----------------------------------------------------------------------------
# Fused kernel: one (batch, channel-tile, time-tile) grid step.
# ----------------------------------------------------------------------------
def caf_fused_kernel(a_ref, v_ref, vp_ref, ap_ref, bnd_ref, o_ref, *, combine_dtype):
    # a_ref  : (1, tc, tt*F)    lane-dense audio tile (time x freq flattened onto lanes)
    # v_ref  : (1, tc, Cvg, Tv) grouped video features for this channel slice
    # vp_ref : (tc, 2*Cvg + 2)  packed [f1_w_mean | f2_w | f1_b_mean | f2_b]
    # ap_ref : (tc, 4)          packed [p1_w, p1_b, p2_w, p2_b]
    # bnd_ref: (Tv, 2)          int32 [lo, hi] column bounds for nearest interpolation
    # o_ref  : (1, tc, tt*F)
    Cvg = v_ref.shape[2]
    Tv = v_ref.shape[3]
    cols = a_ref.shape[2]                          # tt * F

    # ---------------- video path (tiny; recomputed per tile, hidden under DMA) ----
    v = v_ref[0].astype(jnp.float32)               # (tc, Cvg, Tv)
    vp = vp_ref[...].astype(jnp.float32)
    f1w = vp[:, 0:Cvg]                             # head-mean already folded in
    f2w = vp[:, Cvg:2 * Cvg]
    f1b = vp[:, 2 * Cvg:2 * Cvg + 1]               # (tc, 1)
    f2b = vp[:, 2 * Cvg + 1:2 * Cvg + 2]           # (tc, 1)

    # grouped 1x1 convs: contraction dim Cvg is tiny -> unroll on the VPU (no MXU).
    logits = f1w[:, 0:1] * v[:, 0, :]
    key = f2w[:, 0:1] * v[:, 0, :]
    for i in range(1, Cvg):                        # static unroll, Cvg is small
        vi = v[:, i, :]
        logits = logits + f1w[:, i:i + 1] * vi
        key = key + f2w[:, i:i + 1] * vi
    logits = logits + f1b                          # (tc, Tv)
    key = key + f2b                                # (tc, Tv)

    # softmax over video time (head mean already applied via folded weights)
    logits = logits - jnp.max(logits, axis=-1, keepdims=True)
    e = jnp.exp(logits)
    attn = e * pl.reciprocal(jnp.sum(e, axis=-1, keepdims=True), approx=True)  # (tc, Tv)

    # -------- nearest interpolation Tv -> audio time, broadcast over F, lane-dense --
    # Flattened output column c of this tile has global index u = tile_t*cols + c.
    # Video step s is selected iff lo[s] <= u < hi[s] with lo[s] = F*ceil(s*Ta/Tv)
    # (precomputed in the wrapper) — exact integer test, no in-kernel division.
    u = (pl.program_id(2) * cols
         + jax.lax.broadcasted_iota(jnp.int32, (Tv, cols), 1))
    lo = bnd_ref[:, 0:1]                           # (Tv, 1)
    hi = bnd_ref[:, 1:2]                           # (Tv, 1)
    sel = jnp.logical_and(u >= lo, u < hi).astype(jnp.float32)        # (Tv, cols)
    attn_t = jnp.dot(attn, sel, preferred_element_type=jnp.float32)   # (tc, cols)
    key_t = jnp.dot(key, sel, preferred_element_type=jnp.float32)     # (tc, cols)

    # -------- audio depthwise 1x1 convs + gated combine (the mem-bound hot path) ----
    x = a_ref[0].astype(combine_dtype)             # (tc, cols)
    ap = ap_ref[...].astype(combine_dtype)         # (tc, 4)
    value = x * ap[:, 0:1] + ap[:, 1:2]                       # audio_conv_p1 (+ Identity)
    gate = jnp.maximum(x * ap[:, 2:3] + ap[:, 3:4], 0.0)      # audio_conv_p2 (+ ReLU)
    o_ref[0] = (key_t.astype(combine_dtype) * gate
                + attn_t.astype(combine_dtype) * value).astype(o_ref.dtype)


# ----------------------------------------------------------------------------
# Tiling / per-generation tuning
# ----------------------------------------------------------------------------
def _device_tuning():
    try:
        kind = jax.devices()[0].device_kind.lower()
    except Exception:
        kind = ""
    if "v7" in kind or "7x" in kind:
        # 64 MiB VMEM/TC, 2 TCs, ~3.2 TB/s HBM: smaller blocks, guarantee >=2 grid steps,
        # bf16 VALU math allowed.
        return dict(target_elems=512 * 1024, vmem_limit=40 << 20,
                    multi_step=True, bf16_math=True)
    if "v6" in kind:
        # 128 MiB VMEM, 1 TC: bigger blocks, raise the scoped VMEM limit.
        return dict(target_elems=1024 * 1024, vmem_limit=80 << 20,
                    multi_step=False, bf16_math=True)
    if "v5" in kind:
        # 128 MiB VMEM but no bf16 VPU: bf16 is I/O-only, keep f32 math.
        return dict(target_elems=1024 * 1024, vmem_limit=80 << 20,
                    multi_step=False, bf16_math=False)
    # Unknown device: conservative.
    return dict(target_elems=512 * 1024, vmem_limit=32 << 20,
                multi_step=False, bf16_math=False)


def _pick_tiles(B, Ca, Ta, F, target_elems, want_multi_step):
    """Pick (ca_tile, time_tile).  Lane constraint: tt*F % 128 == 0 or tt == Ta.
    Sublane constraint: tc % 8 == 0 or tc == Ca.  Never falls back to a block larger
    than the smallest legal one; tiles Ca too if the time axis alone is not enough."""
    def time_ok(tt):
        return Ta % tt == 0 and ((tt * F) % 128 == 0 or tt == Ta)

    def ca_ok(tc):
        return Ca % tc == 0 and (tc % 8 == 0 or tc == Ca)

    tts = [tt for tt in range(Ta, 0, -1) if time_ok(tt)]   # largest first
    tcs = [tc for tc in range(Ca, 0, -1) if ca_ok(tc)]     # largest first

    tc, tt = tcs[-1], tts[-1]                               # smallest legal fallback
    done = False
    for c in tcs:                                           # prefer keeping Ca whole
        for t in tts:                                       # then the largest time tile
            if c * t * F <= target_elems:
                tc, tt = c, t
                done = True
                break
        if done:
            break

    # v7x: both TensorCores should get at least one grid step.
    if want_multi_step and B * (Ca // tc) * (Ta // tt) < 2:
        smaller_t = [t for t in tts if t < tt]
        smaller_c = [c for c in tcs if c < tc]
        if smaller_t:
            tt = smaller_t[0]
        elif smaller_c:
            tc = smaller_c[0]
    return tc, tt


# ----------------------------------------------------------------------------
# Wrapper
# ----------------------------------------------------------------------------
def caf_forward(audio_features, video_features, params, num_heads,
                time_tile=None, ca_tile=None, combine_dtype=None):
    B, Ca, Ta, F = audio_features.shape
    Bv, Cv, Tv = video_features.shape
    assert Bv == B
    Cvg = Cv // Ca
    assert Ca * Cvg == Cv, "video_channels must be divisible by audio_channels"
    assert Ta * Tv < 2**31 and Ta * F < 2**31, "int32 overflow in interpolation index math"

    tune = _device_tuning()
    out_dtype = audio_features.dtype
    if combine_dtype is None:
        combine_dtype = (jnp.bfloat16
                         if (out_dtype == jnp.bfloat16 and tune["bf16_math"])
                         else jnp.float32)

    # Lane-dense layout for the hot stream: flatten (Ta, F) -> Ta*F (free, contiguous).
    # No dtype cast here: native-dtype I/O, upcast happens inside the kernel only.
    audio_flat = audio_features.reshape(B, Ca, Ta * F)
    video_grouped = video_features.reshape(B, Ca, Cvg, Tv)

    # Fold the head-mean into f1 (mean is linear and happens before the softmax).
    f1w_m = jnp.mean(params["f1_w"].astype(jnp.float32), axis=1)                 # (Ca, Cvg)
    f1b_m = jnp.mean(params["f1_b"].astype(jnp.float32), axis=1, keepdims=True)  # (Ca, 1)
    f2w = params["f2_w"].astype(jnp.float32)                                     # (Ca, Cvg)
    f2b = params["f2_b"].reshape(Ca, 1).astype(jnp.float32)

    # Pack the small per-channel parameters into two lane-packed arrays.
    vparams = jnp.concatenate([f1w_m, f2w, f1b_m, f2b], axis=1)                  # (Ca, 2*Cvg+2)
    aparams = jnp.stack([params["p1_w"], params["p1_b"],
                         params["p2_w"], params["p2_b"]],
                        axis=1).astype(jnp.float32)                              # (Ca, 4)

    # Nearest-interp column bounds: lo[s] = F*ceil(s*Ta/Tv); column u (flattened time*F)
    # selects video step s iff lo[s] <= u < lo[s+1].  Exact integers, computed host-side.
    lo_list = [F * (-(-(s * Ta) // Tv)) for s in range(Tv + 1)]
    bounds = jnp.array([[lo_list[s], lo_list[s + 1]] for s in range(Tv)],
                       dtype=jnp.int32)                                          # (Tv, 2)

    tc, tt = _pick_tiles(B, Ca, Ta, F, tune["target_elems"], tune["multi_step"])
    if time_tile is not None:
        tt = time_tile
    if ca_tile is not None:
        tc = ca_tile
    assert Ta % tt == 0 and Ca % tc == 0, "tiles must divide the axes"
    assert (tt * F) % 128 == 0 or tt == Ta, "time tile must keep the last block dim lane-dense"
    assert tc % 8 == 0 or tc == Ca, "channel tile must be sublane-aligned or the whole axis"

    grid = (B, Ca // tc, Ta // tt)
    kernel = functools.partial(caf_fused_kernel, combine_dtype=combine_dtype)

    out_flat = pl.pallas_call(
        kernel,
        out_shape=jax.ShapeDtypeStruct((B, Ca, Ta * F), out_dtype),
        grid=grid,
        in_specs=[
            pl.BlockSpec((1, tc, tt * F), lambda b, c, t: (b, c, t)),
            pl.BlockSpec((1, tc, Cvg, Tv), lambda b, c, t: (b, c, 0, 0)),
            pl.BlockSpec((tc, 2 * Cvg + 2), lambda b, c, t: (c, 0)),
            pl.BlockSpec((tc, 4), lambda b, c, t: (c, 0)),
            pl.BlockSpec((Tv, 2), lambda b, c, t: (0, 0)),
        ],
        out_specs=pl.BlockSpec((1, tc, tt * F), lambda b, c, t: (b, c, t)),
        compiler_params=pltpu.CompilerParams(
            dimension_semantics=("parallel", "parallel", "parallel"),
            vmem_limit_bytes=tune["vmem_limit"],
        ),
    )(audio_flat, video_grouped, vparams, aparams, bounds)
    return out_flat.reshape(B, Ca, Ta, F)


# ----------------------------------------------------------------------------
# Pure-JAX reference (un-folded parameters) for verification
# ----------------------------------------------------------------------------
def caf_reference(audio, video, params, num_heads):
    B, Ca, Ta, F = audio.shape
    _, Cv, Tv = video.shape
    Cvg = Cv // Ca
    val = audio * params["p1_w"].reshape(1, Ca, 1, 1) + params["p1_b"].reshape(1, Ca, 1, 1)
    gate = jax.nn.relu(audio * params["p2_w"].reshape(1, Ca, 1, 1)
                       + params["p2_b"].reshape(1, Ca, 1, 1))
    v = video.reshape(B, Ca, Cvg, Tv)
    attn = jnp.einsum("ghi,bgit->bght", params["f1_w"], v) + params["f1_b"][None, :, :, None]
    attn = attn.mean(axis=2)
    attn = jax.nn.softmax(attn, axis=-1)
    key = jnp.einsum("gi,bgit->bgt", params["f2_w"], v) + params["f2_b"].reshape(1, Ca, 1)
    idx = (jnp.arange(Ta) * Tv) // Ta          # nearest: floor(t*Tv/Ta)
    attn = jnp.take(attn, idx, axis=-1)
    key = jnp.take(key, idx, axis=-1)
    return key[..., None] * gate + attn[..., None] * val


if __name__ == "__main__":
    # small shapes: B=2, Ca=4, Cv=8 (Cvg=2), Ta=16 (audio time), Tv=8 (video time),
    # F=16 (freq), num_heads=4
    B, Ca, Cv, Ta, Tv, F, H = 2, 4, 8, 16, 8, 16, 4

    root = jax.random.PRNGKey(0)
    ks = jax.random.split(root, 10)
    audio = jax.random.normal(ks[0], (B, Ca, Ta, F), dtype=jnp.float32)
    video = jax.random.normal(ks[1], (B, Cv, Tv), dtype=jnp.float32)

    params = {
        # depthwise 1x1 Conv2d (groups=Ca): per-channel scale + bias
        "p1_w": jax.random.normal(ks[2], (Ca,), dtype=jnp.float32) * 0.5,
        "p1_b": jax.random.normal(ks[3], (Ca,), dtype=jnp.float32) * 0.1,
        "p2_w": jax.random.normal(ks[4], (Ca,), dtype=jnp.float32) * 0.5,
        "p2_b": jax.random.normal(ks[5], (Ca,), dtype=jnp.float32) * 0.1,
        # grouped 1x1 Conv1d f1: (Ca groups, H out/group, Cvg in/group)
        "f1_w": jax.random.normal(ks[6], (Ca, H, Cv // Ca), dtype=jnp.float32) * 0.3,
        "f1_b": jax.random.normal(ks[7], (Ca, H), dtype=jnp.float32) * 0.1,
        # grouped 1x1 Conv1d f2: (Ca groups, Cvg in/group) -> 1 out/group
        "f2_w": jax.random.normal(ks[8], (Ca, Cv // Ca), dtype=jnp.float32) * 0.3,
        "f2_b": jax.random.normal(ks[9], (Ca, 1), dtype=jnp.float32) * 0.1,
    }

    ref = caf_reference(audio, video, params, num_heads=H)

    # 1) auto-tiled path
    out = caf_forward(audio, video, params, num_heads=H)
    out = jax.block_until_ready(out)
    assert out.shape == (B, Ca, Ta, F)
    assert out.dtype == audio.dtype
    assert jnp.allclose(out, ref, atol=1e-3, rtol=1e-3), "mismatch vs reference (auto tile)"

    # 2) forced time-tiling to exercise the multi-tile / in-kernel interpolation path
    out_tiled = caf_forward(audio, video, params, num_heads=H, time_tile=8)
    out_tiled = jax.block_until_ready(out_tiled)
    assert jnp.allclose(out_tiled, ref, atol=1e-3, rtol=1e-3), "mismatch vs reference (tiled)"

    # 3) bf16 I/O path (native-dtype in/out; halves HBM traffic on the mem-bound combine)
    out_bf16 = caf_forward(audio.astype(jnp.bfloat16), video.astype(jnp.bfloat16),
                           params, num_heads=H, time_tile=8)
    out_bf16 = jax.block_until_ready(out_bf16)
    assert out_bf16.dtype == jnp.bfloat16
    assert jnp.allclose(out_bf16.astype(jnp.float32), ref, atol=1e-1, rtol=1e-1), \
        "mismatch vs reference (bf16 I/O)"

    print("KERNEL_OK")
</pallas_src>

<mosaic_0001>
module attributes {stable_mosaic.version = 11 : i64} {
  func.func @caf_fused_kernel(%arg0: i32, %arg1: i32, %arg2: i32, %arg3: memref<1x4x256xf32, #tpu.memory_space<vmem>>, %arg4: memref<1x4x2x8xf32, #tpu.memory_space<vmem>>, %arg5: memref<4x6xf32, #tpu.memory_space<vmem>>, %arg6: memref<4x4xf32, #tpu.memory_space<vmem>>, %arg7: memref<8x2xi32, #tpu.memory_space<vmem>>, %arg8: memref<1x4x256xf32, #tpu.memory_space<vmem>>) attributes {dimension_semantics = [#tpu.dimension_semantics<parallel>, #tpu.dimension_semantics<parallel>, #tpu.dimension_semantics<parallel>], iteration_bounds = array<i64: 2, 1, 1>, scalar_prefetch = 0 : i64, scratch_operands = 0 : i64, tpu.core_type = #tpu.core_type<tc>, window_params = [{transform_indices = @transform_0, window_bounds = array<i64: 1, 4, 256>}, {transform_indices = @transform_1, window_bounds = array<i64: 1, 4, 2, 8>}, {transform_indices = @transform_2, window_bounds = array<i64: 4, 6>}, {transform_indices = @transform_3, window_bounds = array<i64: 4, 4>}, {pipeline_mode = #tpu.pipeline_mode<synchronous>, transform_indices = @transform_4, window_bounds = array<i64: 8, 2>}, {transform_indices = @transform_5, window_bounds = array<i64: 1, 4, 256>}]} {
    %c0 = arith.constant 0 : index
    %c0_0 = arith.constant 0 : index
    %c0_1 = arith.constant 0 : index
    %c0_2 = arith.constant 0 : index
    %0 = vector.load %arg4[%c0, %c0_0, %c0_1, %c0_2] : memref<1x4x2x8xf32, #tpu.memory_space<vmem>>, vector<1x4x2x8xf32>
    %1 = vector.shape_cast %0 : vector<1x4x2x8xf32> to vector<4x2x8xf32>
    %c0_3 = arith.constant 0 : index
    %c0_4 = arith.constant 0 : index
    %2 = vector.load %arg5[%c0_3, %c0_4] : memref<4x6xf32, #tpu.memory_space<vmem>>, vector<4x6xf32>
    %3 = vector.extract_strided_slice %2 {offsets = [0, 0], sizes = [4, 2], strides = [1, 1]} : vector<4x6xf32> to vector<4x2xf32>
    %4 = vector.extract_strided_slice %2 {offsets = [0, 2], sizes = [4, 2], strides = [1, 1]} : vector<4x6xf32> to vector<4x2xf32>
    %5 = vector.extract_strided_slice %2 {offsets = [0, 4], sizes = [4, 1], strides = [1, 1]} : vector<4x6xf32> to vector<4x1xf32>
    %6 = vector.extract_strided_slice %2 {offsets = [0, 5], sizes = [4, 1], strides = [1, 1]} : vector<4x6xf32> to vector<4x1xf32>
    %7 = vector.extract_strided_slice %3 {offsets = [0, 0], sizes = [4, 1], strides = [1, 1]} : vector<4x2xf32> to vector<4x1xf32>
    %8 = vector.extract_strided_slice %1 {offsets = [0, 0, 0], sizes = [4, 1, 8], strides = [1, 1, 1]} : vector<4x2x8xf32> to vector<4x1x8xf32>
    %9 = vector.shape_cast %8 : vector<4x1x8xf32> to vector<4x8xf32>
    %10 = vector.broadcast %7 : vector<4x1xf32> to vector<4x8xf32>
    %11 = arith.mulf %10, %9 : vector<4x8xf32>
    %12 = vector.extract_strided_slice %4 {offsets = [0, 0], sizes = [4, 1], strides = [1, 1]} : vector<4x2xf32> to vector<4x1xf32>
    %13 = vector.extract_strided_slice %1 {offsets = [0, 0, 0], sizes = [4, 1, 8], strides = [1, 1, 1]} : vector<4x2x8xf32> to vector<4x1x8xf32>
    %14 = vector.shape_cast %13 : vector<4x1x8xf32> to vector<4x8xf32>
    %15 = vector.broadcast %12 : vector<4x1xf32> to vector<4x8xf32>
    %16 = arith.mulf %15, %14 : vector<4x8xf32>
    %17 = vector.extract_strided_slice %1 {offsets = [0, 1, 0], sizes = [4, 1, 8], strides = [1, 1, 1]} : vector<4x2x8xf32> to vector<4x1x8xf32>
    %18 = vector.shape_cast %17 : vector<4x1x8xf32> to vector<4x8xf32>
    %19 = vector.extract_strided_slice %3 {offsets = [0, 1], sizes = [4, 1], strides = [1, 1]} : vector<4x2xf32> to vector<4x1xf32>
    %20 = vector.broadcast %19 : vector<4x1xf32> to vector<4x8xf32>
    %21 = arith.mulf %20, %18 : vector<4x8xf32>
    %22 = arith.addf %11, %21 : vector<4x8xf32>
    %23 = vector.extract_strided_slice %4 {offsets = [0, 1], sizes = [4, 1], strides = [1, 1]} : vector<4x2xf32> to vector<4x1xf32>
    %24 = vector.broadcast %23 : vector<4x1xf32> to vector<4x8xf32>
    %25 = arith.mulf %24, %18 : vector<4x8xf32>
    %26 = arith.addf %16, %25 : vector<4x8xf32>
    %27 = vector.broadcast %5 : vector<4x1xf32> to vector<4x8xf32>
    %28 = arith.addf %22, %27 : vector<4x8xf32>
    %29 = vector.broadcast %6 : vector<4x1xf32> to vector<4x8xf32>
    %30 = arith.addf %26, %29 : vector<4x8xf32>
    %cst = arith.constant dense<0xFF800000> : vector<4xf32>
    %31 = vector.multi_reduction <maximumf>, %28, %cst [1] : vector<4x8xf32> to vector<4xf32>
    %32 = vector.shape_cast %31 : vector<4xf32> to vector<4x1xf32>
    %33 = vector.broadcast %32 : vector<4x1xf32> to vector<4x8xf32>
    %34 = arith.subf %28, %33 : vector<4x8xf32>
    %35 = math.exp %34 : vector<4x8xf32>
    %cst_5 = arith.constant dense<0.000000e+00> : vector<4xf32>
    %36 = vector.multi_reduction <add>, %35, %cst_5 [1] : vector<4x8xf32> to vector<4xf32>
    %37 = vector.shape_cast %36 : vector<4xf32> to vector<4x1xf32>
    %38 = tpu.reciprocal %37 {approx = true} : vector<4x1xf32> -> vector<4x1xf32>
    %39 = vector.broadcast %38 : vector<4x1xf32> to vector<4x8xf32>
    %40 = arith.mulf %35, %39 : vector<4x8xf32>
    %c256_i32 = arith.constant 256 : i32
    %41 = arith.muli %arg2, %c256_i32 : i32
    %42 = tpu.iota {dimensions = array<i32: 1>} : vector<8x256xi32>
    %43 = vector.broadcast %41 : i32 to vector<8x256xi32>
    %44 = arith.addi %43, %42 : vector<8x256xi32>
    %c0_6 = arith.constant 0 : index
    %c0_7 = arith.constant 0 : index
    %45 = vector.load %arg7[%c0_6, %c0_7] : memref<8x2xi32, #tpu.memory_space<vmem>>, vector<8x1xi32>
    %c0_8 = arith.constant 0 : index
    %c1 = arith.constant 1 : index
    %46 = vector.load %arg7[%c0_8, %c1] : memref<8x2xi32, #tpu.memory_space<vmem>>, vector<8x1xi32>
    %47 = vector.broadcast %45 : vector<8x1xi32> to vector<8x256xi32>
    %48 = arith.cmpi sge, %44, %47 : vector<8x256xi32>
    %49 = vector.broadcast %46 : vector<8x1xi32> to vector<8x256xi32>
    %50 = arith.cmpi slt, %44, %49 : vector<8x256xi32>
    %51 = arith.andi %48, %50 : vector<8x256xi1>
    %52 = arith.extui %51 : vector<8x256xi1> to vector<8x256xi32>
    %53 = arith.sitofp %52 : vector<8x256xi32> to vector<8x256xf32>
    %cst_9 = arith.constant dense<0.000000e+00> : vector<4x256xf32>
    %54 = tpu.matmul %40, %53, %cst_9 {dimension_numbers = #tpu.dot_dimension_numbers<[1], [0], [0], [1], [0, 0, 1, 1], [], []>} : vector<4x8xf32>, vector<8x256xf32>, vector<4x256xf32> -> vector<4x256xf32>
    %cst_10 = arith.constant dense<0.000000e+00> : vector<4x256xf32>
    %55 = tpu.matmul %30, %53, %cst_10 {dimension_numbers = #tpu.dot_dimension_numbers<[1], [0], [0], [1], [0, 0, 1, 1], [], []>} : vector<4x8xf32>, vector<8x256xf32>, vector<4x256xf32> -> vector<4x256xf32>
    %c0_11 = arith.constant 0 : index
    %c0_12 = arith.constant 0 : index
    %c0_13 = arith.constant 0 : index
    %56 = vector.load %arg3[%c0_11, %c0_12, %c0_13] : memref<1x4x256xf32, #tpu.memory_space<vmem>>, vector<1x4x256xf32>
    %57 = vector.shape_cast %56 : vector<1x4x256xf32> to vector<4x256xf32>
    %c0_14 = arith.constant 0 : index
    %c0_15 = arith.constant 0 : index
    %58 = vector.load %arg6[%c0_14, %c0_15] : memref<4x4xf32, #tpu.memory_space<vmem>>, vector<4x4xf32>
    %59 = vector.extract_strided_slice %58 {offsets = [0, 0], sizes = [4, 1], strides = [1, 1]} : vector<4x4xf32> to vector<4x1xf32>
    %60 = vector.broadcast %59 : vector<4x1xf32> to vector<4x256xf32>
    %61 = arith.mulf %57, %60 : vector<4x256xf32>
    %62 = vector.extract_strided_slice %58 {offsets = [0, 1], sizes = [4, 1], strides = [1, 1]} : vector<4x4xf32> to vector<4x1xf32>
    %63 = vector.broadcast %62 : vector<4x1xf32> to vector<4x256xf32>
    %64 = arith.addf %61, %63 : vector<4x256xf32>
    %65 = vector.extract_strided_slice %58 {offsets = [0, 2], sizes = [4, 1], strides = [1, 1]} : vector<4x4xf32> to vector<4x1xf32>
    %66 = vector.broadcast %65 : vector<4x1xf32> to vector<4x256xf32>
    %67 = arith.mulf %57, %66 : vector<4x256xf32>
    %68 = vector.extract_strided_slice %58 {offsets = [0, 3], sizes = [4, 1], strides = [1, 1]} : vector<4x4xf32> to vector<4x1xf32>
    %69 = vector.broadcast %68 : vector<4x1xf32> to vector<4x256xf32>
    %70 = arith.addf %67, %69 : vector<4x256xf32>
    %cst_16 = arith.constant 0.000000e+00 : f32
    %71 = vector.broadcast %cst_16 : f32 to vector<4x256xf32>
    %72 = arith.maximumf %70, %71 : vector<4x256xf32>
    %73 = arith.mulf %55, %72 : vector<4x256xf32>
    %74 = arith.mulf %54, %64 : vector<4x256xf32>
    %75 = arith.addf %73, %74 : vector<4x256xf32>
    %c0_17 = arith.constant 0 : index
    %c0_18 = arith.constant 0 : index
    %c0_19 = arith.constant 0 : index
    %76 = vector.load %arg8[%c0_17, %c0_18, %c0_19] : memref<1x4x256xf32, #tpu.memory_space<vmem>>, vector<1x4x256xf32>
    %77 = vector.shape_cast %76 : vector<1x4x256xf32> to vector<4x256xf32>
    %78 = vector.shape_cast %75 : vector<4x256xf32> to vector<1x4x256xf32>
    tpu.vector_store %arg8[%c0_17, %c0_18, %c0_19], %78 {strides = array<i32>} : memref<1x4x256xf32, #tpu.memory_space<vmem>>, vector<1x4x256xf32>,
    return
  }
  func.func @transform_0(%arg0: i32, %arg1: i32, %arg2: i32) -> (i32, i32, i32) {
    %c0_i32 = arith.constant 0 : i32
    return %arg0, %arg1, %arg2 : i32, i32, i32
  }
  func.func @transform_1(%arg0: i32, %arg1: i32, %arg2: i32) -> (i32, i32, i32, i32) {
    %c0_i32 = arith.constant 0 : i32
    %c0_i32_0 = arith.constant 0 : i32
    %c0_i32_1 = arith.constant 0 : i32
    return %arg0, %arg1, %c0_i32, %c0_i32_0 : i32, i32, i32, i32
  }
  func.func @transform_2(%arg0: i32, %arg1: i32, %arg2: i32) -> (i32, i32) {
    %c0_i32 = arith.constant 0 : i32
    %c0_i32_0 = arith.constant 0 : i32
    return %arg1, %c0_i32 : i32, i32
  }
  func.func @transform_3(%arg0: i32, %arg1: i32, %arg2: i32) -> (i32, i32) {
    %c0_i32 = arith.constant 0 : i32
    %c0_i32_0 = arith.constant 0 : i32
    return %arg1, %c0_i32 : i32, i32
  }
  func.func @transform_4(%arg0: i32, %arg1: i32, %arg2: i32) -> (i32, i32) {
    %c0_i32 = arith.constant 0 : i32
    %c0_i32_0 = arith.constant 0 : i32
    %c0_i32_1 = arith.constant 0 : i32
    return %c0_i32, %c0_i32_0 : i32, i32
  }
  func.func @transform_5(%arg0: i32, %arg1: i32, %arg2: i32) -> (i32, i32, i32) {
    %c0_i32 = arith.constant 0 : i32
    return %arg0, %arg1, %arg2 : i32, i32, i32
  }
}

</mosaic_0001>

<bundles_post_ra>
// kernel: tpu_custom_call.1
= control target key start
LH: loop header
LB: loop body
LE: loop exit
PB: predicated region body
PF: predicated region fallthrough
CT: control target
= control target key end

     0   :  { %10 = vsyncpa [#allocation3], 0  ;;  %s1410_s0 = inlined_call_operand.hbm [shape: f32[2,4,256], index: 0, kind: input, shape index: {}]   ;;  %s1411_s1 = inlined_call_operand.hbm [shape: f32[2,4,2,8], index: 1, kind: input, shape index: {}]   ;;  %s1412_s2 = inlined_call_operand.vmem [shape: f32[4,6], index: 2, kind: input, shape index: {}]   ;;  %s1413_s3 = inlined_call_operand.vmem [shape: f32[4,4], index: 3, kind: input, shape index: {}]   ;;  %s1414_s4 = inlined_call_operand.vmem [shape: s32[8,2], index: 4, kind: input, shape index: {}]   ;;  %s1415_s5 = inlined_call_operand.hbm [shape: f32[2,4,256], index: 5, kind: output, shape index: {}]  }
   0x1   :  { %12 = vsyncpa [#allocation3 + $0x1], 0 }
   0x2   :  { %13 = vsyncpa [#allocation6], 0 }
   0x3   :  { %15 = vsyncpa [#allocation6 + $0x1], 0 }
   0x4   :  { %16 = vsyncpa [#allocation4], 0 }
   0x5   :  { %18 = vsyncpa [#allocation4 + $0x1], 0  ;;  %s1150_s18 = smov 0   ;;  %s1152_s19 = smov 0  }
   0x6   :  { %s1154_s20 = smov 0   ;;  %s1156_s21 = smov 0  }
   0x7   :  { %s1158_s22 = smov 0   ;;  %s1160_s23 = smov 0  }
   0x8 LB: > { %s832_s24 = sadd.s32 4294967295, %s1104_s23   ;;  %s833_s25 = sadd.s32 4294967294, %s1104_s23   ;;  %s1104_s23 = sphi %s1160_s23, %s24_s23   ;;  %s1100_s22 = sphi %s1158_s22, %s1437_s22   ;;  %s1096_s21 = sphi %s1156_s21, %s1436_s21   ;;  %s1092_s20 = sphi %s1154_s20, %s1435_s20   ;;  %s1088_s19 = sphi %s1152_s19, %s1434_s19   ;;  %s1084_s18 = sphi %s1150_s18, %s1433_s18  }
   0x9   : > { %s43_s26 = sadd.s32 1, %s1100_s22  ;;  %s54_s27 = sadd.s32 1, %s1092_s20 }
   0xa   : > { %p45_p0 = scmp.ge.s32.totalorder %s43_s26, 2  ;;  %p61_p1 = scmp.ne.s32.totalorder %s1092_s20, %s1088_s19 }
   0xb   : > { %p62_p2 = scmp.eq.s32.totalorder %s1104_s23, 0  ;;  %p67_p3 = scmp.ne.s32.totalorder %s1088_s19, %s1084_s18 }
   0xc   : > { %s1439_s26 = smov (%p45_p0, %s43_s26), 0  ;;  %p68_p5 = scmp.eq.s32.totalorder %s832_s24, 0 }
   0xd   : > { %1420 = sst [smem:[#allocation11_spill]] %s1439_s26  ;;  %p1191_p4 = por %p62_p2, %p61_p1 }
   0xe   : > { %s47_s29 = ssub.s32 %s1100_s22, %s1439_s26  ;;  %p196_p6 = scmp.eq.s32.totalorder %s832_s24, 1 }
   0xf   : > { %p52_p7 = scmp.eq.s32.totalorder %s47_s29, 0  ;;  %p1197_p8 = por %p68_p5, %p67_p3 }
  0x10   : > { %p1201_p9 = por %p196_p6, %p61_p1  ;;  %p202_p10 = scmp.eq.s32.totalorder %s833_s25, 1 }
  0x11   : > { %s1422_s30 = scalar_select %p1197_p8, 1, 0 }
  0x12   : > { %s1423_s6 = scalar_select %p1201_p9, 1, 0 }
  0x13   : > { %s1206_s7 = scalar_select %p52_p7, %s1092_s20, %s54_s27  }
  0x14   : > { %p1208_p11 = por %p202_p10, %p67_p3  ;;  %p881_p13 = scmp.lt.s32.totalorder %s1104_s23, 2 }
  0x15   : > { %s1215_s9 = sand.u32 1, %s1092_s20   ;;  %s861_s11 = sshll.u32 %s1100_s22, 7 }
  0x16   : > { %s1424_s8 = scalar_select %p1208_p11, 1, 0 }
  0x17   : > { %s1416_s10 = sshll.u32 %s1215_s9, 3  ;;  %s1222_s14 = scalar_lea.hbm %s1410_s0, %s861_s11 }
  0x18   : > { %s243_s15 = scalar_lea.vmem [#allocation2], %s1416_s10  ;;  %p1230_p0 = pnand %p881_p13, %p1191_p4 }
  0x19   : > { %s255_s16 = sshll.u32 %s243_s15, 4  ;;  %s1237_s27 = scalar_lea.hbm %s1411_s1, %s861_s11  ;;  %s1226_s16 = int_to_ptr.vmem [resolvable:$true] %s255_s16 }
  0x1a   : > { %s240_s29 = scalar_lea.sflag [#allocation3], %s1215_s9  ;;  %s958_s12 = scalar_lea.hbm %s1222_s14, 128 }
  0x1b   : > { %p959_p1 = scmp.ne.s32.totalorder %s1222_s14, %s958_s12  ;;  %p960_p2 = pneg %p1230_p0 }
  0x1c   : > { %s963_s15 = scalar_lea.hbm %s1410_s0, 256  ;;  %p964_p4 = scmp.lt.u32.totalorder %s1222_s14, %s1410_s0 }
  0x1d   : > { %p961_p3 = pnand %p960_p2, %p959_p1  ;;  %p965_p6 = scmp.lt.u32.totalorder %s963_s15, %s958_s12 }
  0x1e   : > { %p967_p10 = scmp.lt.u32.totalorder %s958_s12, %s1222_s14 }
  0x1f   : > { %p962_p5 = pneg %p961_p3  ;;  %p966_p7 = por %p965_p6, %p964_p4 }
  0x21   : > { %p968_p13 = por %p967_p10, %p966_p7 }
  0x23   : > { %p969_p12 = pnand %p968_p13, %p962_p5 }
  0x25   : > { %972 = shalt.err (!%p969_p12)
}
  0x26   : > { %s973_s11 = scalar_lea.vmem %s1226_s16, 128  ;;  %s1106_s24 = smov [#allocation2]  }
  0x27   : > { %p974_p1 = scmp.ne.s32.totalorder %s1226_s16, %s973_s11  ;;  %s978_s25 = sshll.u32 %s1106_s24, 4  ;;  %s979_s25 = int_to_ptr.vmem [resolvable:$false] %s978_s25 }
  0x28   : > { %s980_s26 = scalar_lea.vmem %s979_s25, 256  ;;  %p981_p9 = scmp.lt.s32.totalorder %s1226_s16, %s979_s25 }
  0x29   : > { %p976_p3 = pnand %p974_p1, %p960_p2  ;;  %p982_p4 = scmp.lt.s32.totalorder %s980_s26, %s973_s11 }
  0x2b   : > { %p977_p11 = pneg %p976_p3  ;;  %p983_p6 = por %p982_p4, %p981_p9 }
  0x2d   : > { %p984_p7 = pnand %p983_p6, %p977_p11 }
  0x2f   : > { %987 = shalt.err (!%p984_p7)
}
  0x30   : > { %873 = dma.hbm_to_vmem [thread:$0]  (!%p1230_p0), %s1222_s14, 128, %s1226_s16, %s240_s29  }
  0x31   : > { %s1426_s10 = sshll.u32 %s1215_s9, 3  ;;  %p844_p9 = scmp.ge.s32.totalorder %s1104_s23, 1 }
  0x32   : > { %s266_s12 = scalar_lea.vmem [#allocation5], %s1426_s10  ;;  %p283_p11 = scmp.lt.s32.totalorder %s1104_s23, 3 }
  0x33   : > { %s275_s28 = sshll.u32 %s266_s12, 4  ;;  %s263_s15 = scalar_lea.sflag [#allocation6], %s1215_s9  ;;  %s1268_s28 = int_to_ptr.vmem [resolvable:$true] %s275_s28 }
  0x34   : > { %p1271_p12 = pnand %p844_p9, %p283_p11  ;;  %s988_s11 = scalar_lea.hbm %s1237_s27, 128 }
  0x35   : > { %p989_p5 = scmp.ne.s32.totalorder %s1237_s27, %s988_s11  ;;  %s993_s29 = scalar_lea.hbm %s1411_s1, 256 }
  0x36   : > { %p994_p1 = scmp.lt.u32.totalorder %s1237_s27, %s1411_s1  ;;  %p995_p3 = scmp.lt.u32.totalorder %s993_s29, %s988_s11 }
  0x37   : > { %p991_p10 = pnand %p989_p5, %p960_p2  ;;  %p997_p6 = scmp.lt.u32.totalorder %s988_s11, %s1237_s27 }
  0x38   : > { %p996_p4 = por %p995_p3, %p994_p1 }
  0x39   : > { %p992_p13 = pneg %p991_p10 }
  0x3a   : > { %p998_p7 = por %p997_p6, %p996_p4 }
  0x3c   : > { %p999_p9 = pnand %p998_p7, %p992_p13 }
  0x3e   : > { %1002 = shalt.err (!%p999_p9)
}
  0x3f   : > { %s1003_s26 = scalar_lea.vmem %s1268_s28, 128  ;;  %s1107_s10 = smov [#allocation5]  }
  0x40   : > { %p1004_p11 = scmp.ne.s32.totalorder %s1268_s28, %s1003_s26  ;;  %s1008_s12 = sshll.u32 %s1107_s10, 4  ;;  %s1009_s12 = int_to_ptr.vmem [resolvable:$false] %s1008_s12 }
  0x41   : > { %s1010_s14 = scalar_lea.vmem %s1009_s12, 256  ;;  %p1011_p8 = scmp.lt.s32.totalorder %s1268_s28, %s1009_s12 }
  0x42   : > { %p1006_p5 = pnand %p1004_p11, %p960_p2  ;;  %p1012_p1 = scmp.lt.s32.totalorder %s1010_s14, %s1003_s26 }
  0x44   : > { %p1007_p10 = pneg %p1006_p5  ;;  %p1013_p3 = por %p1012_p1, %p1011_p8 }
  0x46   : > { %p1014_p4 = pnand %p1013_p3, %p1007_p10 }
  0x48   : > { %1017 = shalt.err (!%p1014_p4)
}
  0x49   : > { %s1108_s11 = smov 32   ;;  %s1109_s16 = smov 2  }
  0x4a   : > { %876 = dma.hbm_to_vmem [thread:$0]  (!%p1230_p0), %s1237_s27, 128, %s1268_s28, %s263_s15, %s1108_s11, %s1108_s11, %s1109_s16  }
  0x4b   : > { %287 = sbr.rel (%p1271_p12) target bundleno = 774 (0x306), region = 40  ;;  %s1304_s29 = sand.u32 (!%p1271_p12), 1, %s1088_s19  }
  0x4c   : > { %s1307_s24 = sshll.u32 (!%p1271_p12), %s1304_s29, 3  ;;  %s290_s25 = scalar_lea.sflag (!%p1271_p12), [#allocation3], %s1304_s29 }
  0x4d   : > { %s293_s26 = scalar_lea.vmem (!%p1271_p12), [#allocation2], %s1307_s24  ;;  %p1428_p8 = scmp.ne.s32.totalorder (!%p1271_p12), %s1422_s30, 0 }
  0x52   : > { %1071 = dma.done.wait (%p1428_p8), %s290_s25, 128  }
  0x53   : > { %1073 = vsyncadd (%p1428_p8), %s290_s25, 4294967168  ;;  %s299_s9 = scalar_lea.sflag [#allocation6], %s1304_s29  ;;  %s302_s17 = scalar_lea.vmem [#allocation5], %s1307_s24 }
  0x54   : > { %1075 = dma.done.wait (%p1428_p8), %s299_s9, 128  }
  0x55   : > { %1077 = vsyncadd (%p1428_p8), %s299_s9, 4294967168  ;;  %v1110_v0 = vmov 0   ;;  %v1111_v1 = vmov 4   ;;  %v1325_v2 = vld [vmem:[%s1412_s2] sm:$0xf]  ;;  %v1112_v3 = vmov 1   ;;  %v425_v38 = vlaneseq }
  0x56   : > { %942 = vset.pattern.permute.xlu0 %v1110_v0  ;;  %944 = vset.pattern.permute.xlu1 %v1111_v1  ;;  %v354_v4 = vld [vmem:[%s302_s17 + $0x2] sm:$0x3]  ;;  %v353_v5 = vld [vmem:[%s302_s17] sm:$0x3]  ;;  %v355_v6 = vld [vmem:[%s302_s17 + $0x4] sm:$0x3] }
  0x57   : > { %360 = vperm.xlu0 %942, %v1325_v2   ;;  %403 = vperm.xlu1 %944, %v1325_v2   ;;  %v367_v7 = vrot.slane %v354_v4, 7  ;;  %v387_v8 = vrot.slane %v353_v5, 1  ;;  %vm368_vm0 = vcmask 1041409   ;;  %v356_v9 = vld [vmem:[%s302_s17 + $0x6] sm:$0x3]  ;;  %v370_v10 = vrot.slane %v355_v6, 6 }
  0x58   : > { %v389_v11 = vrot.slane %v355_v6, 7  ;;  %vm371_vm1 = vcmask 1042434   ;;  %v373_v14 = vrot.slane %v356_v9, 5  ;;  %v391_v15 = vrot.slane %v356_v9, 6  ;;  %v431_v30 = vld [vmem:[%s1414_s4] sm:$0xff]  ;;  %s863_s12 = sshll.u32 %s1096_s21, 7 }
  0x59   : > { %v369_v12 = vsel %vm368_vm0, %v367_v7, %v353_v5  ;;  %v388_v13 = vsel %vm368_vm0, %v354_v4, %v387_v8  ;;  %vm374_vm2 = vcmask 1043459   ;;  %vm412_vm3 = vcmask 60416   ;;  %v598_v45 = vld [vmem:[%s1413_s3] sm:$0xf]  ;;  %s341_s14 = scalar_lea.vmem [#allocation7], %s1307_s24  ;;  %s667_s9 = scalar_lea.sflag [#allocation4], %s1304_s29 }
  0x5a   : > { %v372_v17 = vsel %vm371_vm1, %v370_v10, %v369_v12  ;;  %v390_v18 = vsel %vm371_vm1, %v389_v11, %v388_v13  ;;  %v1113_v28 = vmov 2   ;;  %v1114_v29 = vmov 3   ;;  %s685_s11 = sshll.u32 %s341_s14, 4  ;;  %p1429_p2 = scmp.ne.s32.totalorder %s1423_s6, 0  ;;  %s1363_s11 = int_to_ptr.vmem [resolvable:$true] %s685_s11 }
  0x5b   : > { %943 = vset.pattern.permute.xlu0 %v1112_v3  ;;  %v1331_v19 = vsel %vm374_vm2, %v373_v14, %v372_v17  ;;  %v1333_v20 = vsel %vm374_vm2, %v391_v15, %v390_v18  ;;  %945 = vset.pattern.permute.xlu1 %v1113_v28  ;;  %v1115_v31 = vmov 5   ;;  %v426_v40 = vand.u32 127, %v425_v38  ;;  %s1018_s17 = scalar_lea.vmem %s1363_s11, 128  ;;  %s1119_s21 = smov [#allocation7]  }
  0x5c   : > { %384 = vperm.xlu0 %943, %v1325_v2   ;;  %v1116_v43 = vmov 1.0   ;;  %v1117_v44 = vmov 0.0   ;;  %vm448_vm10 = vcmask 64512   ;;  %v1118_v56 = vmov 839922192   ;;  %p1019_p0 = scmp.ne.s32.totalorder %s1363_s11, %s1018_s17  ;;  %s1022_s24 = sshll.u32 %s1119_s21, 4  ;;  %s1023_s24 = int_to_ptr.vmem [resolvable:$false] %s1022_s24 }
  0x5d   : > { %v427_v41 = vadd.s32 128, %v426_v40  ;;  %516 = vmatprep.mubr.f32.mxu0 %v1117_v44  ;;  %590 = vmatprep.mubr.f32.mxu1 %v1117_v44  ;;  %v604_v57 = vunpack.c.l.s4 %v1118_v56  ;;  %v607_v58 = vshrl.u32 %v425_v38, 7  ;;  %s1024_s27 = scalar_lea.vmem %s1023_s24, 256  ;;  %p1025_p6 = scmp.lt.s32.totalorder %s1363_s11, %s1023_s24 }
  0x5e   : > { %p1020_p12 = pnand %p1019_p0, %p1429_p2  ;;  %p1026_p7 = scmp.lt.s32.totalorder %s1024_s27, %s1018_s17 }
  0x5f   : > { %v605_v59 = vunpack.c.0.s8 %v604_v57 }
  0x60   : > { %946 = vset.pattern.permute.xlu0 %v1114_v29  ;;  %p1021_p13 = pneg %p1020_p12  ;;  %p1027_p9 = por %p1026_p7, %p1025_p6 }
  0x61   : > { %v608_v61 = vsub.s32 %v605_v59, %v607_v58 }
  0x62   : > { %p1028_p11 = pnand %p1027_p9, %p1021_p13 }
  0xd6   : > { %v361_v16 = vpop.permute.xlu0 %360  ;;  %v404_v24 = vpop.permute.xlu1 %403 }
  0xd7   : > { %v377_v22 = vmul.f32 %v1331_v19, %v361_v16 }
  0xdb   : > { %v385_v21 = vpop.permute.xlu0 %384 }
  0xdc   : > { %v394_v23 = vmul.f32 %v1333_v20, %v385_v21 }
  0xde   : > { %v395_v25 = vadd.f32 %v394_v23, %v377_v22 }
  0xe0   : > { %v406_v26 = vadd.f32 %v404_v24, %v395_v25 }
  0xe2   : > { %v413_v27 = vsel %vm412_vm3, %v406_v26, -inf }
  0xe3   : > { %414 = vmax.xlane.f32.xlu1 %v413_v27 }
  0xf4   : > { %379 = vperm.xlu1 %945, %v1325_v2  }
  0xf8   : > { %947 = vset.pattern.permute.xlu1 %v1110_v0 }
  0xf9   : > { %433 = vperm.xlu1 %947, %v431_v30  }
  0xfd   : > { %948 = vset.pattern.permute.xlu1 %v1112_v3 }
  0xfe   : > { %438 = vperm.xlu1 %948, %v431_v30  }
 0x102   : > { %949 = vset.pattern.permute.xlu1 %v1115_v31 }
 0x103   : > { %408 = vperm.xlu1 %949, %v1325_v2  }
 0x107   : > { %950 = vset.pattern.permute.xlu1 %v1113_v28 }
 0x108   : > { %625 = vperm.xlu1 %950, %v598_v45  }
 0x10c   : > { %951 = vset.pattern.permute.xlu1 %v1110_v0  ;;  %v597_v0 = vld [vmem:[%s293_s26] sm:$0xff]  ;;  %s1361_s26 = scalar_lea.hbm %s1415_s5, %s863_s12 }
 0x10d   : > { %601 = vperm.xlu1 %951, %v598_v45  }
 0x111   : > { %952 = vset.pattern.permute.xlu1 %v1114_v29 }
 0x112   : > { %637 = vperm.xlu1 %952, %v598_v45  }
 0x116   : > { %953 = vset.pattern.permute.xlu1 %v1112_v3 }
 0x117   : > { %613 = vperm.xlu1 %953, %v598_v45  }
 0x170   : > { %v415_v32 = vpop.xlane.xlu1 %414 }
 0x171   : > { %v416_v33 = vsub.f32 %v406_v26, %v415_v32 }
 0x173   : > { %v417_v34 = vmul.f32 1.442695, %v416_v33 }
 0x174   : > { %v380_v37 = vpop.permute.xlu1 %379 }
 0x175   : > { %954 = vpow2.f32 %v417_v34  ;;  %v382_v48 = vmul.f32 %v380_v37, %v1331_v19 }
 0x178   : > { %v434_v39 = vpop.permute.xlu1 %433 }
 0x179   : > { %vm435_vm4 = vcmp.ge.s32.totalorder %v426_v40, %v434_v39  ;;  %vm436_vm6 = vcmp.ge.s32.totalorder %v427_v41, %v434_v39 }
 0x17d   : > { %v439_v42 = vpop.permute.xlu1 %438 }
 0x17e   : > { %vm440_vm5 = vcmp.lt.s32.totalorder %v426_v40, %v439_v42  ;;  %vm441_vm7 = vcmp.lt.s32.totalorder %v427_v41, %v439_v42 }
 0x17f   : > { %v955_v35 = vpop.eup %954  ;;  %vm443_vm8 = vmand %vm436_vm6, %vm441_vm7 }
 0x180   : > { %v419_v36 = vsel %vm412_vm3, %v955_v35, 0.0  ;;  %850 = vmatprep.subr.msk.mxu0 %vm443_vm8, %v1116_v43  ;;  %853 = vmatprep.subr.msk.mxu1 %vm443_vm8, %v1116_v43  ;;  %vm442_vm9 = vmand %vm435_vm4, %vm440_vm5 }
 0x181   : > { %420 = vadd.xlane.f32.xlu0 %v419_v36  ;;  %851 = vmatpush1.msk.msra.mxu0 %vm442_vm9, %v1116_v43 }
 0x182   : > { %854 = vmatpush1.msk.msra.mxu1 %vm442_vm9, %v1116_v43  ;;  %v409_v50 = vpop.permute.xlu1 %408 }
 0x187   : > { %v626_v55 = vpop.permute.xlu1 %625 }
 0x188   : > { %v633_v63 = vrot.slane %v626_v55, %v608_v61 }
 0x18c   : > { %v602_v60 = vpop.permute.xlu1 %601 }
 0x18d   : > { %v609_v1 = vrot.slane %v602_v60, %v608_v61 }
 0x18f   : > { %v611_v5 = vmul.f32 %v609_v1, %v597_v0 }
 0x191   : > { %v638_v62 = vpop.permute.xlu1 %637 }
 0x192   : > { %v645_v3 = vrot.slane %v638_v62, %v608_v61 }
 0x196   : > { %v614_v4 = vpop.permute.xlu1 %613 }
 0x197   : > { %397 = vperm.xlu0 %946, %v1325_v2   ;;  %v635_v2 = vmul.f32 %v633_v63, %v597_v0  ;;  %v621_v6 = vrot.slane %v614_v4, %v608_v61 }
 0x199   : > { %v647_v7 = vadd.f32 %v645_v3, %v635_v2  ;;  %v623_v8 = vadd.f32 %v621_v6, %v611_v5 }
 0x19b   : > { %v648_v9 = vmax.f32 %v647_v7, 0.0  ;;  %v655_v11 = vcombine.high %v623_v8, %v623_v8 }
 0x19d   : > { %v650_v15 = vcombine.high %v648_v9, %v648_v9 }
 0x20e   : > { %v421_v46 = vpop.xlane.xlu0 %420 }
 0x20f   : > { %956 = vrcp.f32 %v421_v46 }
 0x216   : > { %v398_v47 = vpop.permute.xlu0 %397 }
 0x217   : > { %v400_v49 = vmul.f32 %v398_v47, %v1333_v20 }
 0x219   : > { %v957_v51 = vpop.eup %956  ;;  %v401_v52 = vadd.f32 %v400_v49, %v382_v48 }
 0x21a   : > { %v423_v53 = vmul.f32 %v957_v51, %v955_v35 }
 0x21b   : > { %v411_v54 = vadd.f32 %v409_v50, %v401_v52 }
 0x21c   : > { %852 = vmatmul.mubr.msk.f32.vlgmr.msra.gmra.mrb[0].mxu0 %vm448_vm10, %v423_v53 }
 0x21d   : > { %855 = vmatmul.mubr.msk.f32.vlgmr.msra.gmra.mrb[0].mxu1 %vm448_vm10, %v411_v54 }
 0x2ef   : > { %v518_v10 = vpop.f32.mrb[0].mxu0 }
 0x2f0   : > { %v657_v12 = vmul.f32 %v623_v8, %v518_v10  ;;  %v520_v13 = vpop.f32.mrb[1].mxu0  ;;  %v592_v14 = vpop.f32.mrb[0].mxu1 }
 0x2f1   : > { %v658_v16 = vmul.f32 %v655_v11, %v520_v13  ;;  %v652_v17 = vmul.f32 %v648_v9, %v592_v14  ;;  %v594_v18 = vpop.f32.mrb[1].mxu1 }
 0x2f2   : > { %v653_v19 = vmul.f32 %v650_v15, %v594_v18 }
 0x2f3   : > { %v659_v20 = vadd.f32 %v657_v12, %v652_v17 }
 0x2f4   : > { %v660_v21 = vadd.f32 %v658_v16, %v653_v19 }
 0x2f6   : > { %v663_v22 = vcombine.low %v659_v20, %v660_v21 }
 0x2f8   : > { %665 = vst [vmem:[%s341_s14] sm:$0xff] %v663_v22 }
 0x2f9   : > { %1031 = shalt.err (!%p1028_p11)
}
 0x2fa   : > { %s1032_s29 = scalar_lea.hbm %s1361_s26, 128  ;;  %s1036_s13 = scalar_lea.hbm %s1415_s5, 256 }
 0x2fb   : > { %p1033_p5 = scmp.ne.s32.totalorder %s1361_s26, %s1032_s29  ;;  %p1037_p3 = scmp.lt.u32.totalorder %s1361_s26, %s1415_s5 }
 0x2fc   : > { %p1038_p4 = scmp.lt.u32.totalorder %s1036_s13, %s1032_s29  ;;  %p1040_p0 = scmp.lt.u32.totalorder %s1032_s29, %s1361_s26 }
 0x2fd   : > { %p1034_p10 = pnand %p1033_p5, %p1429_p2 }
 0x2fe   : > { %p1039_p8 = por %p1038_p4, %p1037_p3 }
 0x2ff   : > { %p1035_p1 = pneg %p1034_p10 }
 0x300   : > { %p1041_p12 = por %p1040_p0, %p1039_p8 }
 0x302   : > { %p1042_p13 = pnand %p1041_p12, %p1035_p1 }
 0x304   : > { %1045 = shalt.err (!%p1042_p13)
}
 0x305   : > { %868 = dma.vmem_to_hbm [thread:$0]  (%p1429_p2), %s1363_s11, 128, %s1361_s26, %s667_s9  }
 0x306 PF: > { %s697_s12 = sand.u32 1, %s1084_s18   ;;  %p1430_p6 = scmp.ne.s32.totalorder %s1424_s8, 0 }
 0x307   : > { %p1431_p7 = scmp.ge.s32.totalorder %s1104_s23, 2  ;;  %s698_s14 = scalar_lea.sflag [#allocation4], %s697_s12 }
 0x309   : > { %p878_p9 = pnand %p1431_p7, %p1430_p6 }
 0x30b   : > { %1079 = dma.done.wait (!%p878_p9), %s698_s14, 128  }
 0x30c   : > { %1081 = vsyncadd (!%p878_p9), %s698_s14, 4294967168  ;;  %s24_s23 = sadd.s32 1, %s1104_s23   ;;  %s1432_s6 = sld [smem:[#allocation11_spill]] }
 0x30d   : > { %p21_p11 = scmp.ge.s32.totalorder %s24_s23, 4   ;;  %s1433_s18 = smov %s1088_s19 }
 0x30e   : > { %s1434_s19 = smov %s1092_s20  ;;  %s1435_s20 = smov %s1206_s7 }
 0x30f   : > { %s1436_s21 = smov %s1100_s22  ;;  %23 = sbr.rel (!%p21_p11) target bundleno = 8 (0x8), region = 104 }
 0x312   : > { %s1437_s22 = smov %s1432_s6 }
 0x316   :  { %703 = vsyncpa [#allocation3], 1 }
 0x317   :  { %705 = vsyncpa [#allocation3 + $0x1], 1 }
 0x318   :  { %706 = vsyncpa [#allocation6], 1 }
 0x319   :  { %708 = vsyncpa [#allocation6 + $0x1], 1 }
 0x31a   :  { %709 = vsyncpa [#allocation4], 1 }
 0x31b   :  { %711 = vsyncpa [#allocation4 + $0x1], 1 }

</bundles_post_ra>
